<compile_context>
chip_gen: v5e
topology: v5e:2x2
jax: 0.10.0
libtpu: 0.0.40
codegen_flags: <defaults>
</compile_context>

<pallas_src>
import functools

import jax
import jax.numpy as jnp
from jax.experimental import pallas as pl
from jax.experimental.pallas import tpu as pltpu

LAYER_NORM_EPS = 1e-12  # CANINE default config.layer_norm_eps


def _round_up(x, m):
    return ((x + m - 1) // m) * m


def _self_output_kernel(x_ref, w_ref, b_ref, g_ref, be_ref, r_ref, o_ref, *, h_real):
    # dense: x @ W (+ b).  x/W are bf16 -> MXU, accumulate in f32.
    h = jnp.dot(x_ref[...], w_ref[...], preferred_element_type=jnp.float32)

    # TODO(synk): dropout is a no-op in eval mode; training-mode dropout
    # (pltpu.prng_random_bits masking) not implemented here.

    # bias + residual add in f32
    y = h + b_ref[...] + r_ref[...].astype(jnp.float32)

    h_pad = y.shape[-1]
    inv_h = 1.0 / float(h_real)
    if h_real == h_pad:
        # LayerNorm over the (lane-dense) hidden axis
        mean = jnp.sum(y, axis=-1, keepdims=True) * inv_h
        centered = y - mean
    else:
        # hidden dim was padded to a multiple of 128; mask the pad lanes out of
        # the statistics so mean/var match the un-padded module exactly.
        lane = jax.lax.broadcasted_iota(jnp.int32, y.shape, 1)
        mask = lane < h_real
        y = jnp.where(mask, y, 0.0)
        mean = jnp.sum(y, axis=-1, keepdims=True) * inv_h
        centered = jnp.where(mask, y - mean, 0.0)

    var = jnp.sum(centered * centered, axis=-1, keepdims=True) * inv_h
    inv = jax.lax.rsqrt(var + LAYER_NORM_EPS)
    out = centered * inv * g_ref[...] + be_ref[...]
    o_ref[...] = out.astype(o_ref.dtype)


def canine_self_output(hidden_states, input_tensor, weight, bias, gamma, beta,
                       *, row_tile=256):
    """hidden_states, input_tensor: [B, S, H] float32.
    weight: [H, H] stored as [in, out] (i.e. x @ weight == PyTorch x @ W.T);
    bias / gamma / beta: [H]."""
    B, S, H = hidden_states.shape
    M = B * S

    # Lane-dense hidden dim; adaptive, 8-aligned row tile; pad the ragged tail.
    H_pad = _round_up(H, 128)
    m_tile = min(row_tile, _round_up(M, 8))
    M_pad = _round_up(M, m_tile)

    # bf16 MXU operands; everything added after the matmul stays f32.
    x2 = hidden_states.reshape(M, H).astype(jnp.bfloat16)
    r2 = input_tensor.reshape(M, H).astype(jnp.float32)
    w2 = weight.astype(jnp.bfloat16)

    if M_pad != M or H_pad != H:
        x2 = jnp.pad(x2, ((0, M_pad - M), (0, H_pad - H)))
        r2 = jnp.pad(r2, ((0, M_pad - M), (0, H_pad - H)))
    if H_pad != H:
        w2 = jnp.pad(w2, ((0, H_pad - H), (0, H_pad - H)))
        bias = jnp.pad(bias, (0, H_pad - H))
        gamma = jnp.pad(gamma, (0, H_pad - H))
        beta = jnp.pad(beta, (0, H_pad - H))

    b2 = bias.reshape(1, H_pad).astype(jnp.float32)
    g2 = gamma.reshape(1, H_pad).astype(jnp.float32)
    be2 = beta.reshape(1, H_pad).astype(jnp.float32)

    grid = (M_pad // m_tile,)

    cost = pl.CostEstimate(
        flops=2 * M_pad * H_pad * H_pad,
        transcendentals=M_pad,
        bytes_accessed=(x2.size * 2 + w2.size * 2 + r2.size * 4
                        + b2.size * 4 * 3 + M_pad * H_pad * 4),
    )

    kernel = functools.partial(_self_output_kernel, h_real=H)

    out = pl.pallas_call(
        kernel,
        out_shape=jax.ShapeDtypeStruct((M_pad, H_pad), hidden_states.dtype),
        grid_spec=pltpu.PrefetchScalarGridSpec(
            num_scalar_prefetch=0,
            grid=grid,
            in_specs=[
                pl.BlockSpec((m_tile, H_pad), lambda i: (i, 0)),    # x rows (bf16)
                pl.BlockSpec((H_pad, H_pad), lambda i: (0, 0)),     # weight (bf16, resident)
                pl.BlockSpec((1, H_pad), lambda i: (0, 0)),         # bias
                pl.BlockSpec((1, H_pad), lambda i: (0, 0)),         # gamma
                pl.BlockSpec((1, H_pad), lambda i: (0, 0)),         # beta
                pl.BlockSpec((m_tile, H_pad), lambda i: (i, 0)),    # residual rows (f32)
            ],
            out_specs=pl.BlockSpec((m_tile, H_pad), lambda i: (i, 0)),
        ),
        compiler_params=pltpu.CompilerParams(
            dimension_semantics=("parallel",)),
        cost_estimate=cost,
    )(x2, w2, b2, g2, be2, r2)

    return out[:M, :H].reshape(B, S, H)


def _reference(hidden_states, input_tensor, weight, bias, gamma, beta):
    h = hidden_states @ weight + bias
    y = h + input_tensor
    mean = jnp.mean(y, axis=-1, keepdims=True)
    var = jnp.mean((y - mean) ** 2, axis=-1, keepdims=True)
    return (y - mean) * jax.lax.rsqrt(var + LAYER_NORM_EPS) * gamma + beta


if __name__ == "__main__":
    B, S, H = 2, 8, 32  # batch, seq, hidden_size (toy shapes)

    key = jax.random.PRNGKey(0)
    k1, k2, k3, k4 = jax.random.split(key, 4)

    hidden_states = jax.random.normal(k1, (B, S, H), dtype=jnp.float32)
    input_tensor = jax.random.normal(k2, (B, S, H), dtype=jnp.float32)

    # Linear weight stored as [in, out] (equivalent to x @ W.T in PyTorch).
    weight = jax.random.normal(k3, (H, H), dtype=jnp.float32) * (1.0 / jnp.sqrt(H))
    bias = jax.random.normal(k4, (H,), dtype=jnp.float32) * 0.02
    gamma = jnp.ones((H,), dtype=jnp.float32)
    beta = jnp.zeros((H,), dtype=jnp.float32)

    out = canine_self_output(hidden_states, input_tensor, weight, bias, gamma, beta)
    out = jax.block_until_ready(out)
    assert out.shape == (B, S, H)

    # Tight check against a reference that uses the same bf16-rounded matmul
    # operands (isolates kernel correctness from the bf16 input cast)...
    xq = hidden_states.astype(jnp.bfloat16).astype(jnp.float32)
    wq = weight.astype(jnp.bfloat16).astype(jnp.float32)
    ref_q = _reference(xq, input_tensor, wq, bias, gamma, beta)
    assert jnp.allclose(out, ref_q, atol=2e-3, rtol=2e-3), "mismatch vs bf16-rounded reference"

    # ...and a loose check against the exact f32 module semantics.
    ref = _reference(hidden_states, input_tensor, weight, bias, gamma, beta)
    assert jnp.allclose(out, ref, atol=5e-2, rtol=5e-2), "mismatch vs f32 reference"

    # Second shape: exercises multi-step grid + ragged-tail / hidden padding.
    B2, S2 = 3, 100  # M = 300 -> padded to 384 with row_tile=128 (grid of 3)
    h2 = jax.random.normal(k1, (B2, S2, H), dtype=jnp.float32)
    r2 = jax.random.normal(k2, (B2, S2, H), dtype=jnp.float32)
    out2 = canine_self_output(h2, r2, weight, bias, gamma, beta, row_tile=128)
    out2 = jax.block_until_ready(out2)
    ref2 = _reference(h2.astype(jnp.bfloat16).astype(jnp.float32), r2,
                      wq, bias, gamma, beta)
    assert out2.shape == (B2, S2, H)
    assert jnp.allclose(out2, ref2, atol=2e-3, rtol=2e-3), "mismatch on ragged shape"

    print("KERNEL_OK")
</pallas_src>

<mosaic_0001>
module attributes {stable_mosaic.version = 11 : i64} {
  func.func @_self_output_kernel(%arg0: i32, %arg1: memref<16x128xbf16, #tpu.memory_space<vmem>>, %arg2: memref<128x128xbf16, #tpu.memory_space<vmem>>, %arg3: memref<1x128xf32, #tpu.memory_space<vmem>>, %arg4: memref<1x128xf32, #tpu.memory_space<vmem>>, %arg5: memref<1x128xf32, #tpu.memory_space<vmem>>, %arg6: memref<16x128xf32, #tpu.memory_space<vmem>>, %arg7: memref<16x128xf32, #tpu.memory_space<vmem>>) attributes {dimension_semantics = [#tpu.dimension_semantics<parallel>], iteration_bounds = array<i64: 1>, scalar_prefetch = 0 : i64, scratch_operands = 0 : i64, tpu.core_type = #tpu.core_type<tc>, window_params = [{transform_indices = @transform_0, window_bounds = array<i64: 16, 128>}, {pipeline_mode = #tpu.pipeline_mode<synchronous>, transform_indices = @transform_1, window_bounds = array<i64: 128, 128>}, {pipeline_mode = #tpu.pipeline_mode<synchronous>, transform_indices = @transform_2, window_bounds = array<i64: 1, 128>}, {pipeline_mode = #tpu.pipeline_mode<synchronous>, transform_indices = @transform_3, window_bounds = array<i64: 1, 128>}, {pipeline_mode = #tpu.pipeline_mode<synchronous>, transform_indices = @transform_4, window_bounds = array<i64: 1, 128>}, {transform_indices = @transform_5, window_bounds = array<i64: 16, 128>}, {transform_indices = @transform_6, window_bounds = array<i64: 16, 128>}]} {
    %c0 = arith.constant 0 : index
    %c0_0 = arith.constant 0 : index
    %0 = vector.load %arg1[%c0, %c0_0] : memref<16x128xbf16, #tpu.memory_space<vmem>>, vector<16x128xbf16>
    %c0_1 = arith.constant 0 : index
    %c0_2 = arith.constant 0 : index
    %1 = vector.load %arg2[%c0_1, %c0_2] : memref<128x128xbf16, #tpu.memory_space<vmem>>, vector<128x128xbf16>
    %cst = arith.constant dense<0.000000e+00> : vector<16x128xf32>
    %2 = tpu.matmul %0, %1, %cst {dimension_numbers = #tpu.dot_dimension_numbers<[1], [0], [0], [1], [0, 0, 1, 1], [], []>} : vector<16x128xbf16>, vector<128x128xbf16>, vector<16x128xf32> -> vector<16x128xf32>
    %c0_3 = arith.constant 0 : index
    %c0_4 = arith.constant 0 : index
    %3 = vector.load %arg3[%c0_3, %c0_4] : memref<1x128xf32, #tpu.memory_space<vmem>>, vector<1x128xf32>
    %4 = vector.broadcast %3 : vector<1x128xf32> to vector<16x128xf32>
    %5 = arith.addf %2, %4 : vector<16x128xf32>
    %c0_5 = arith.constant 0 : index
    %c0_6 = arith.constant 0 : index
    %6 = vector.load %arg6[%c0_5, %c0_6] : memref<16x128xf32, #tpu.memory_space<vmem>>, vector<16x128xf32>
    %7 = arith.addf %5, %6 : vector<16x128xf32>
    %8 = tpu.iota {dimensions = array<i32: 1>} : vector<16x128xi32>
    %c32_i32 = arith.constant 32 : i32
    %9 = vector.broadcast %c32_i32 : i32 to vector<16x128xi32>
    %10 = arith.cmpi slt, %8, %9 : vector<16x128xi32>
    %cst_7 = arith.constant 0.000000e+00 : f32
    %11 = vector.broadcast %cst_7 : f32 to vector<16x128xf32>
    %12 = arith.select %10, %7, %11 : vector<16x128xi1>, vector<16x128xf32>
    %cst_8 = arith.constant dense<0.000000e+00> : vector<16xf32>
    %13 = vector.multi_reduction <add>, %12, %cst_8 [1] : vector<16x128xf32> to vector<16xf32>
    %14 = vector.shape_cast %13 : vector<16xf32> to vector<16x1xf32>
    %cst_9 = arith.constant 3.125000e-02 : f32
    %15 = vector.broadcast %cst_9 : f32 to vector<16x1xf32>
    %16 = arith.mulf %14, %15 : vector<16x1xf32>
    %17 = vector.broadcast %16 : vector<16x1xf32> to vector<16x128xf32>
    %18 = arith.subf %12, %17 : vector<16x128xf32>
    %cst_10 = arith.constant 0.000000e+00 : f32
    %19 = vector.broadcast %cst_10 : f32 to vector<16x128xf32>
    %20 = arith.select %10, %18, %19 : vector<16x128xi1>, vector<16x128xf32>
    %21 = arith.mulf %20, %20 : vector<16x128xf32>
    %cst_11 = arith.constant dense<0.000000e+00> : vector<16xf32>
    %22 = vector.multi_reduction <add>, %21, %cst_11 [1] : vector<16x128xf32> to vector<16xf32>
    %23 = vector.shape_cast %22 : vector<16xf32> to vector<16x1xf32>
    %cst_12 = arith.constant 3.125000e-02 : f32
    %24 = vector.broadcast %cst_12 : f32 to vector<16x1xf32>
    %25 = arith.mulf %23, %24 : vector<16x1xf32>
    %cst_13 = arith.constant 9.99999996E-13 : f32
    %26 = vector.broadcast %cst_13 : f32 to vector<16x1xf32>
    %27 = arith.addf %25, %26 : vector<16x1xf32>
    %28 = math.rsqrt %27 : vector<16x1xf32>
    %29 = vector.broadcast %28 : vector<16x1xf32> to vector<16x128xf32>
    %30 = arith.mulf %20, %29 : vector<16x128xf32>
    %c0_14 = arith.constant 0 : index
    %c0_15 = arith.constant 0 : index
    %31 = vector.load %arg4[%c0_14, %c0_15] : memref<1x128xf32, #tpu.memory_space<vmem>>, vector<1x128xf32>
    %32 = vector.broadcast %31 : vector<1x128xf32> to vector<16x128xf32>
    %33 = arith.mulf %30, %32 : vector<16x128xf32>
    %c0_16 = arith.constant 0 : index
    %c0_17 = arith.constant 0 : index
    %34 = vector.load %arg5[%c0_16, %c0_17] : memref<1x128xf32, #tpu.memory_space<vmem>>, vector<1x128xf32>
    %35 = vector.broadcast %34 : vector<1x128xf32> to vector<16x128xf32>
    %36 = arith.addf %33, %35 : vector<16x128xf32>
    %c0_18 = arith.constant 0 : index
    %c0_19 = arith.constant 0 : index
    %37 = vector.load %arg7[%c0_18, %c0_19] : memref<16x128xf32, #tpu.memory_space<vmem>>, vector<16x128xf32>
    tpu.vector_store %arg7[%c0_18, %c0_19], %36 {strides = array<i32>} : memref<16x128xf32, #tpu.memory_space<vmem>>, vector<16x128xf32>,
    return
  }
  func.func @transform_0(%arg0: i32) -> (i32, i32) {
    %c0_i32 = arith.constant 0 : i32
    %c0_i32_0 = arith.constant 0 : i32
    return %arg0, %c0_i32 : i32, i32
  }
  func.func @transform_1(%arg0: i32) -> (i32, i32) {
    %c0_i32 = arith.constant 0 : i32
    %c0_i32_0 = arith.constant 0 : i32
    %c0_i32_1 = arith.constant 0 : i32
    return %c0_i32, %c0_i32_0 : i32, i32
  }
  func.func @transform_2(%arg0: i32) -> (i32, i32) {
    %c0_i32 = arith.constant 0 : i32
    %c0_i32_0 = arith.constant 0 : i32
    %c0_i32_1 = arith.constant 0 : i32
    return %c0_i32, %c0_i32_0 : i32, i32
  }
  func.func @transform_3(%arg0: i32) -> (i32, i32) {
    %c0_i32 = arith.constant 0 : i32
    %c0_i32_0 = arith.constant 0 : i32
    %c0_i32_1 = arith.constant 0 : i32
    return %c0_i32, %c0_i32_0 : i32, i32
  }
  func.func @transform_4(%arg0: i32) -> (i32, i32) {
    %c0_i32 = arith.constant 0 : i32
    %c0_i32_0 = arith.constant 0 : i32
    %c0_i32_1 = arith.constant 0 : i32
    return %c0_i32, %c0_i32_0 : i32, i32
  }
  func.func @transform_5(%arg0: i32) -> (i32, i32) {
    %c0_i32 = arith.constant 0 : i32
    %c0_i32_0 = arith.constant 0 : i32
    return %arg0, %c0_i32 : i32, i32
  }
  func.func @transform_6(%arg0: i32) -> (i32, i32) {
    %c0_i32 = arith.constant 0 : i32
    %c0_i32_0 = arith.constant 0 : i32
    return %arg0, %c0_i32 : i32, i32
  }
}

</mosaic_0001>

<bundles_post_ra>
// kernel: tpu_custom_call.1
= control target key start
LH: loop header
LB: loop body
LE: loop exit
PB: predicated region body
PF: predicated region fallthrough
CT: control target
= control target key end

     0   :  { %11 = vsyncpa [#allocation3], 0  ;;  %s482_s0 = inlined_call_operand.hbm [shape: bf16[16,128], index: 0, kind: input, shape index: {}]   ;;  %s483_s1 = inlined_call_operand.hbm [shape: bf16[128,128], index: 1, kind: input, shape index: {}]   ;;  %s484_s2 = inlined_call_operand.vmem [shape: f32[1,128], index: 2, kind: input, shape index: {}]   ;;  %s485_s3 = inlined_call_operand.vmem [shape: f32[1,128], index: 3, kind: input, shape index: {}]   ;;  %s486_s4 = inlined_call_operand.vmem [shape: f32[1,128], index: 4, kind: input, shape index: {}]   ;;  %s487_s5 = inlined_call_operand.hbm [shape: f32[16,128], index: 5, kind: input, shape index: {}]   ;;  %s488_s6 = inlined_call_operand.hbm [shape: f32[16,128], index: 6, kind: output, shape index: {}]  }
   0x1   :  { %12 = vsyncpa [#allocation6], 0 }
   0x2   :  { %13 = vsyncpa [#allocation4], 0  ;;  %s31_s23 = sshll.u32 %s483_s1, 4  ;;  %s408_s24 = smov [#allocation5]   ;;  %s32_s23 = int_to_ptr.hbm [resolvable:$true] %s31_s23 }
   0x3   :  { %s33_s25 = sshll.u32 %s408_s24, 4  ;;  %s18_s28 = sshll.u32 %s482_s0, 4  ;;  %s34_s25 = int_to_ptr.vmem [resolvable:$true] %s33_s25  ;;  %s19_s28 = int_to_ptr.hbm [resolvable:$true] %s18_s28 }
   0x4   :  { %s409_s29 = smov 64   ;;  %s410_s30 = smov 4  }
   0x5   :  { %39 = dma.hbm_to_vmem [thread:$0]  %s32_s23, 1024, %s34_s25, [#allocation6], %s409_s29, %s409_s29, %s410_s30  }
   0x6   :  { %s411_s7 = smov [#allocation2]   ;;  %s50_s11 = sshll.u32 %s487_s5, 4  ;;  %s51_s11 = int_to_ptr.hbm [resolvable:$true] %s50_s11 }
   0x7   :  { %s20_s8 = sshll.u32 %s411_s7, 4  ;;  %s412_s1 = smov [#allocation7]   ;;  %s21_s8 = int_to_ptr.vmem [resolvable:$true] %s20_s8 }
   0x8   :  { %26 = dma.hbm_to_vmem [thread:$0]  %s19_s28, 128, %s21_s8, [#allocation3], %s409_s29, %s409_s29, %s410_s30  }
   0x9   :  { %s52_s12 = sshll.u32 %s412_s1, 4  ;;  %s413_s13 = smov 128   ;;  %s53_s12 = int_to_ptr.vmem [resolvable:$true] %s52_s12 }
   0xa   :  { %s414_s14 = smov 8  }
   0xb   :  { %58 = dma.hbm_to_vmem [thread:$0]  %s51_s11, 256, %s53_s12, [#allocation6], %s413_s13, %s413_s13, %s414_s14  }
   0xc   :  { %402 = dma.done.wait [#allocation3], 128  }
   0xd   :  { %403 = vsyncadd [#allocation3], 4294967168 }
   0xe   :  { %404 = dma.done.wait [#allocation6], 1280  }
   0xf   :  { %405 = vsyncadd [#allocation6], 4294966016  ;;  %v290_v0 = vld [vmem:[#allocation5 + $0x38] sm:$0xff]  ;;  %v289_v1 = vld [vmem:[#allocation5 + $0x30] sm:$0xff]  ;;  %v165_v9 = vlaneseq  ;;  %s415_s18 = smov [#allocation8]   ;;  %s232_s21 = sshll.u32 %s488_s6, 4  ;;  %s233_s21 = int_to_ptr.hbm [resolvable:$true] %s232_s21 }
  0x10   :  { %147 = vmatpush.bf16.msra.mxu0 %v290_v0  ;;  %v288_v2 = vld [vmem:[#allocation5 + $0x28] sm:$0xff]  ;;  %v287_v3 = vld [vmem:[#allocation5 + $0x20] sm:$0xff]  ;;  %v286_v4 = vld [vmem:[#allocation5 + $0x18] sm:$0xff] }
  0x11   :  { %v285_v5 = vld [vmem:[#allocation5 + $0x10] sm:$0xff]  ;;  %v284_v6 = vld [vmem:[#allocation5 + $0x8] sm:$0xff]  ;;  %v283_v7 = vld [vmem:[#allocation5] sm:$0xff]  ;;  %v166_v11 = vand.u32 127, %v165_v9 }
  0x12   :  { %v282_v8 = vld [vmem:[#allocation2] sm:$0xff]  ;;  %v161_v13 = vld [vmem:[#allocation7] sm:$0xff]  ;;  %v162_v18 = vld [vmem:[#allocation7 + $0x8] sm:$0xff] }
  0x13   :  { %v299_v10 = vld [vmem:[%s484_s2] ss:$0 sm:$0xff]  ;;  %vm167_vm0 = vcmp.lt.s32.totalorder %v166_v11, 32 }
  0x14   :  { %148 = vmatpush.bf16.msra.mxu0 %v289_v1  ;;  %v300_v46 = vld [vmem:[%s485_s3] ss:$0 sm:$0xff]  ;;  %s230_s3 = sshll.u32 %s415_s18, 4  ;;  %s231_s3 = int_to_ptr.vmem [resolvable:$true] %s230_s3 }
  0x15   :  { %v301_v50 = vld [vmem:[%s486_s4] ss:$0 sm:$0xff] }
  0x18   :  { %149 = vmatpush.bf16.msra.mxu0 %v288_v2 }
  0x1c   :  { %150 = vmatpush.bf16.msra.mxu0 %v287_v3 }
  0x20   :  { %151 = vmatpush.bf16.msra.mxu0 %v286_v4 }
  0x24   :  { %152 = vmatpush.bf16.msra.mxu0 %v285_v5 }
  0x28   :  { %153 = vmatpush.bf16.msra.mxu0 %v284_v6 }
  0x2c   :  { %154 = vmatpush.bf16.msra.mxu0 %v283_v7 }
  0x2f   :  { %155 = vmatmul.bf16.vlgmr.msra.gmra.mxu0 %v282_v8 }
  0xac   :  { %v156_v12 = vpop.f32.mrf.mxu0 }
  0xad   :  { %v157_v14 = vadd.f32 %v299_v10, %v156_v12 }
  0xaf   :  { %v163_v15 = vadd.f32 %v161_v13, %v157_v14 }
  0xb1   :  { %v168_v16 = vsel %vm167_vm0, %v163_v15, 0.0 }
  0xb2   :  { %170 = vadd.xlane.f32.xlu0 %v168_v16 }
  0xb4   :  { %v158_v17 = vpop.f32.mrf.mxu0 }
  0xb5   :  { %v159_v19 = vadd.f32 %v299_v10, %v158_v17 }
  0xb7   :  { %v164_v20 = vadd.f32 %v162_v18, %v159_v19 }
  0xb9   :  { %v169_v21 = vsel %vm167_vm0, %v164_v20, 0.0 }
  0xba   :  { %172 = vadd.xlane.f32.xlu0 %v169_v21 }
 0x125   :  { %v171_v22 = vpop.xlane.xlu0 %170 }
 0x126   :  { %v174_v23 = vmul.f32 0.03125, %v171_v22 }
 0x128   :  { %v176_v24 = vsub.f32 %v168_v16, %v174_v23 }
 0x12a   :  { %v178_v25 = vsel %vm167_vm0, %v176_v24, 0.0 }
 0x12b   :  { %v180_v26 = vmul.f32 %v178_v25, %v178_v25 }
 0x12d   :  { %182 = vadd.xlane.f32.xlu1 %v180_v26  ;;  %v173_v27 = vpop.xlane.xlu0 %172 }
 0x12e   :  { %v175_v28 = vmul.f32 0.03125, %v173_v27 }
 0x130   :  { %v177_v29 = vsub.f32 %v169_v21, %v175_v28 }
 0x132   :  { %v179_v30 = vsel %vm167_vm0, %v177_v29, 0.0 }
 0x133   :  { %v181_v31 = vmul.f32 %v179_v30, %v179_v30 }
 0x135   :  { %184 = vadd.xlane.f32.xlu1 %v181_v31 }
 0x1a0   :  { %v183_v32 = vpop.xlane.xlu1 %182 }
 0x1a1   :  { %v186_v33 = vmul.f32 0.03125, %v183_v32 }
 0x1a3   :  { %v188_v34 = vadd.f32 1e-12, %v186_v33 }
 0x1a5   :  { %302 = vrsqrt.f32 %v188_v34  ;;  %vm196_vm2 = vweird.f32 %v188_v34 }
 0x1a8   :  { %v185_v35 = vpop.xlane.xlu1 %184 }
 0x1a9   :  { %v187_v36 = vmul.f32 0.03125, %v185_v35 }
 0x1ab   :  { %v303_v37 = vpop.eup %302  ;;  %v189_v38 = vadd.f32 1e-12, %v187_v36 }
 0x1ac   :  { %v191_v39 = vmul.f32 %v303_v37, %v188_v34  ;;  %vm197_vm1 = vweird.f32 %v303_v37 }
 0x1ad   :  { %304 = vrsqrt.f32 %v189_v38  ;;  %vm198_vm3 = vmor %vm196_vm2, %vm197_vm1  ;;  %vm206_vm5 = vweird.f32 %v189_v38 }
 0x1ae   :  { %v192_v40 = vmul.f32 %v303_v37, %v191_v39 }
 0x1b0   :  { %v193_v41 = vmul.f32 0.5, %v192_v40 }
 0x1b2   :  { %v194_v42 = vsub.f32 1.5, %v193_v41 }
 0x1b3   :  { %v305_v43 = vpop.eup %304 }
 0x1b4   :  { %v195_v44 = vmul.f32 %v303_v37, %v194_v42  ;;  %v201_v45 = vmul.f32 %v305_v43, %v189_v38  ;;  %vm207_vm4 = vweird.f32 %v305_v43 }
 0x1b5   :  { %vm208_vm6 = vmor %vm206_vm5, %vm207_vm4 }
 0x1b6   :  { %v199_v47 = vsel %vm198_vm3, %v303_v37, %v195_v44  ;;  %v202_v48 = vmul.f32 %v305_v43, %v201_v45 }
 0x1b7   :  { %v210_v49 = vmul.f32 %v199_v47, %v178_v25 }
 0x1b8   :  { %v203_v51 = vmul.f32 0.5, %v202_v48 }
 0x1b9   :  { %v216_v52 = vmul.f32 %v300_v46, %v210_v49 }
 0x1ba   :  { %v204_v53 = vsub.f32 1.5, %v203_v51 }
 0x1bb   :  { %v222_v54 = vadd.f32 %v301_v50, %v216_v52 }
 0x1bc   :  { %v205_v55 = vmul.f32 %v305_v43, %v204_v53 }
 0x1bd   :  { %224 = vst [vmem:[#allocation8] sm:$0xff] %v222_v54 }
 0x1be   :  { %v209_v56 = vsel %vm208_vm6, %v305_v43, %v205_v55 }
 0x1bf   :  { %v211_v57 = vmul.f32 %v209_v56, %v179_v30 }
 0x1c1   :  { %v217_v58 = vmul.f32 %v300_v46, %v211_v57 }
 0x1c3   :  { %v223_v59 = vadd.f32 %v301_v50, %v217_v58 }
 0x1c5   :  { %225 = vst [vmem:[#allocation8 + $0x8] sm:$0xff] %v223_v59 }
 0x1c6   :  { %238 = dma.vmem_to_hbm [thread:$0]  %s231_s3, 256, %s233_s21, [#allocation4], %s413_s13, %s413_s13, %s414_s14  }
 0x1c7   :  { %406 = dma.done.wait [#allocation4], 256  }
 0x1c8   :  { %407 = vsyncadd [#allocation4], 4294967040 }
 0x1c9   :  { %243 = vsyncpa [#allocation3], 1 }
 0x1ca   :  { %244 = vsyncpa [#allocation6], 1 }
 0x1cb   :  { %245 = vsyncpa [#allocation4], 1 }

</bundles_post_ra>
